<compile_context>
chip_gen: v6e
topology: v6e:2x2x1
jax: 0.10.0
libtpu: 0.0.40
codegen_flags: <defaults>
</compile_context>

<pallas_src>
import functools

import jax
import jax.numpy as jnp
from jax.experimental import pallas as pl
from jax.experimental.pallas import tpu as pltpu

_ROW_ALIGN = 32           # sublane-tile safe for f32 / bf16 / int8 labels


def _round_up(x, m):
    return (x + m - 1) // m * m


def _nsbce_kernel(seed_ref, out_ref, label_ref, keep_ref, partial_ref, *,
                  threshold, n_rows, n_cols):
    """One row-block: partial_ref[0, 0, :] = per-column sum of BCE elements."""
    i = pl.program_id(0)
    tile_rows = out_ref.shape[0]

    x = out_ref[...].astype(jnp.float32)          # (T, C) logits
    y = label_ref[...].astype(jnp.float32)        # (T, C) targets in {0, 1}
    keep_big = keep_ref[...]                      # (1, C) values in {0, 1e12}

    # --- portable counter-based RNG --------------------------------------
    # murmur-style hash of the global element index mixed with the seed.
    # Pure elementwise integer ops -> lowers on the Mosaic TPU backend AND in
    # interpret mode (unlike pltpu.prng_*).  Streams are decorrelated across
    # blocks by construction (hash of a global counter, not per-block seeds).
    row = jax.lax.broadcasted_iota(jnp.int32, x.shape, 0)
    col = jax.lax.broadcasted_iota(jnp.int32, x.shape, 1)
    g_row = i * tile_rows + row                   # global row index
    idx = (g_row * n_cols + col).astype(jnp.uint32)
    seed_u = seed_ref[0].astype(jnp.uint32)
    h = idx * jnp.uint32(0x9E3779B1) + seed_u * jnp.uint32(0x85EBCA77)
    h = h ^ (h >> 16)
    h = h * jnp.uint32(0x7FEB352D)
    h = h ^ (h >> 15)
    h = h * jnp.uint32(0x846CA68B)
    h = h ^ (h >> 16)                             # uniform uint32 bits

    # rand >= threshold  <=>  bits >= threshold * 2^32   (same distribution;
    # no float-uniform construction -> ~4 fewer VPU ops/elem).
    if threshold <= 0.0:                          # rand >= 0 is always true
        sample = jnp.ones(x.shape, dtype=jnp.bool_)
    elif threshold >= 1.0:                        # rand < 1, never true
        sample = jnp.zeros(x.shape, dtype=jnp.bool_)
    else:
        thr_bits = min(int(round(threshold * 2.0 ** 32)), 2 ** 32 - 1)
        sample = h >= jnp.uint32(thr_bits)

    # --- negative-sampling additive mask (index_fill folded into keep_big) --
    xm = x + jnp.where(sample, y * keep_big, 0.0)

    # --- numerically-stable BCE-with-logits (PyTorch formula) ---------------
    elem = jnp.maximum(xm, 0.0) - xm * y + jnp.log1p(jnp.exp(-jnp.abs(xm)))

    # Tail-row mask: the last block may read past N; those VMEM rows hold
    # uninitialized data that can be Inf/NaN, so use a true select on `elem`
    # (never rely on multiply-by-zero).
    valid = g_row < n_rows
    elem = jnp.where(valid, elem, 0.0)

    # lane-resident partial sums: one sublane reduce, lane-dense (1,1,C) store
    partial_ref[...] = jnp.sum(elem, axis=0, keepdims=True)[None]


def negative_sampling_bce(out, label, cates, *, threshold=0.65, seed=0,
                          block_bytes=4 * 1024 * 1024):
    """Pallas-TPU forward of NegativeSamplingBCE.

    out   : (N, C) float32 logits.
    label : (N, C) targets in {0, 1}.  Caller contract: ship the narrowest
            dtype available (int8 / bf16) straight from the producer -- the
            kernel casts in-VMEM and is HBM-bandwidth bound (f32 labels cost
            3 extra bytes/elem).  Do NOT astype() in a wrapper: that is its
            own full HBM pass and nets ~zero.
    cates : int vector of column indices whose additive mask is forced to 0.
    """
    N, C = out.shape
    assert label.shape == (N, C)

    # index_fill(1, cates, 0) fused with the *1e12 scale.
    cates = jnp.asarray(cates, dtype=jnp.int32)
    keep_big = jnp.full((1, C), 1.0e12, dtype=jnp.float32)
    keep_big = keep_big.at[0, cates].set(0.0)

    # --- tiling: block_bytes covers BOTH input streams; rows 32-aligned -----
    label_itemsize = jnp.dtype(label.dtype).itemsize
    bytes_per_row = C * (4 + label_itemsize)
    tile_rows = max(_ROW_ALIGN,
                    (block_bytes // bytes_per_row) // _ROW_ALIGN * _ROW_ALIGN)
    # keep >= ~4 grid steps so v7x's two TensorCores both get work
    tile_rows = min(tile_rows, _round_up(pl.cdiv(N, 4), _ROW_ALIGN))
    grid = pl.cdiv(N, tile_rows)       # no padding: tail masked in-kernel

    kernel = functools.partial(_nsbce_kernel, threshold=float(threshold),
                               n_rows=N, n_cols=C)
    seed_arr = jnp.array([seed], dtype=jnp.int32)

    partials = pl.pallas_call(
        kernel,
        out_shape=jax.ShapeDtypeStruct((grid, 1, C), jnp.float32),
        grid_spec=pltpu.PrefetchScalarGridSpec(
            num_scalar_prefetch=1,
            grid=(grid,),
            in_specs=[
                pl.BlockSpec((tile_rows, C), lambda i, sref: (i, 0)),   # out
                pl.BlockSpec((tile_rows, C), lambda i, sref: (i, 0)),   # label
                pl.BlockSpec((1, C), lambda i, sref: (0, 0)),           # keep
            ],
            out_specs=pl.BlockSpec((1, 1, C), lambda i, sref: (i, 0, 0)),
        ),
        compiler_params=pltpu.CompilerParams(
            dimension_semantics=("parallel",),
            vmem_limit_bytes=48 * 1024 * 1024),
    )(seed_arr, out, label, keep_big)

    # Final cross-block / cross-lane reduction and mean in plain JAX.
    return jnp.sum(partials) / float(N * C)


# ----------------------------- reference / test -----------------------------

def _bce_mean(x, y):
    elem = jnp.maximum(x, 0.0) - x * y + jnp.log1p(jnp.exp(-jnp.abs(x)))
    return jnp.mean(elem)


def _check_case(key, N, C, cates, label_dtype, block_bytes):
    k1, k2 = jax.random.split(key)
    out = jax.random.normal(k1, (N, C), dtype=jnp.float32)
    label = (jax.random.uniform(k2, (N, C)) > 0.5).astype(label_dtype)
    y32 = label.astype(jnp.float32)
    keep_big = jnp.full((1, C), 1.0e12, jnp.float32).at[0, cates].set(0.0)

    # threshold <= 0 -> every positive label masked (deterministic check)
    l_all = negative_sampling_bce(out, label, cates, threshold=0.0,
                                  block_bytes=block_bytes)
    r_all = _bce_mean(out + y32 * keep_big, y32)
    assert jnp.allclose(l_all, r_all, rtol=1e-4, atol=1e-4), (l_all, r_all)

    # threshold > 1 -> nothing masked == plain BCEWithLogits (deterministic)
    l_none = negative_sampling_bce(out, label, cates, threshold=1.5,
                                   block_bytes=block_bytes)
    r_none = _bce_mean(out, y32)
    assert jnp.allclose(l_none, r_none, rtol=1e-4, atol=1e-4), (l_none, r_none)

    # real threshold: stochastic (in-kernel RNG); per-element monotonicity
    # guarantees l_all <= l_mid <= l_none for any RNG realization.
    l_mid = negative_sampling_bce(out, label, cates, threshold=0.65, seed=7,
                                  block_bytes=block_bytes)
    l_mid = jax.block_until_ready(l_mid)
    assert bool(jnp.isfinite(l_mid)), l_mid
    assert float(l_all) - 1e-3 <= float(l_mid) <= float(l_none) + 1e-3, (
        l_all, l_mid, l_none)


if __name__ == "__main__":
    root = jax.random.PRNGKey(0)
    k_a, k_b = jax.random.split(root)

    # multi-block grid (parallel partial-sum outputs), int8 labels (contract)
    _check_case(k_a, N=256, C=256,
                cates=jnp.array([0, 3, 7, 10, 100, 255], dtype=jnp.int32),
                label_dtype=jnp.int8, block_bytes=128 * 1024)

    # non-divisible N (in-kernel tail-mask path, no padding) + bf16 labels
    _check_case(k_b, N=50, C=384,
                cates=jnp.array([1, 2, 5, 300], dtype=jnp.int32),
                label_dtype=jnp.bfloat16, block_bytes=4 * 1024 * 1024)

    print("KERNEL_OK")
</pallas_src>

<mosaic_0001>
module attributes {stable_mosaic.version = 11 : i64} {
  func.func @_nsbce_kernel(%arg0: i32, %arg1: memref<1xi32, #tpu.memory_space<smem>>, %arg2: memref<64x256xf32, #tpu.memory_space<vmem>>, %arg3: memref<64x256xi8, #tpu.memory_space<vmem>>, %arg4: memref<1x256xf32, #tpu.memory_space<vmem>>, %arg5: memref<1x1x256xf32, #tpu.memory_space<vmem>>) attributes {dimension_semantics = [#tpu.dimension_semantics<parallel>], iteration_bounds = array<i64: 4>, scalar_prefetch = 1 : i64, scratch_operands = 0 : i64, tpu.core_type = #tpu.core_type<tc>, window_params = [{transform_indices = @transform_0, window_bounds = array<i64: 64, 256>}, {transform_indices = @transform_1, window_bounds = array<i64: 64, 256>}, {pipeline_mode = #tpu.pipeline_mode<synchronous>, transform_indices = @transform_2, window_bounds = array<i64: 1, 256>}, {transform_indices = @transform_3, window_bounds = array<i64: 1, 1, 256>}]} {
    %c0 = arith.constant 0 : index
    %c0_0 = arith.constant 0 : index
    %0 = vector.load %arg2[%c0, %c0_0] : memref<64x256xf32, #tpu.memory_space<vmem>>, vector<64x256xf32>
    %c0_1 = arith.constant 0 : index
    %c0_2 = arith.constant 0 : index
    %1 = vector.load %arg3[%c0_1, %c0_2] : memref<64x256xi8, #tpu.memory_space<vmem>>, vector<64x256xi8>
    %2 = arith.sitofp %1 : vector<64x256xi8> to vector<64x256xf32>
    %c0_3 = arith.constant 0 : index
    %c0_4 = arith.constant 0 : index
    %3 = vector.load %arg4[%c0_3, %c0_4] : memref<1x256xf32, #tpu.memory_space<vmem>>, vector<1x256xf32>
    %4 = tpu.iota {dimensions = array<i32: 0>} : vector<64x256xi32>
    %c64_i32 = arith.constant 64 : i32
    %5 = arith.muli %arg0, %c64_i32 : i32
    %6 = vector.broadcast %5 : i32 to vector<64x256xi32>
    %7 = arith.addi %6, %4 : vector<64x256xi32>
    %true = arith.constant true
    %8 = vector.broadcast %true : i1 to vector<64x256xi1>
    %9 = vector.broadcast %3 : vector<1x256xf32> to vector<64x256xf32>
    %10 = arith.mulf %2, %9 : vector<64x256xf32>
    %cst = arith.constant 0.000000e+00 : f32
    %11 = vector.broadcast %cst : f32 to vector<64x256xf32>
    %12 = arith.select %8, %10, %11 : vector<64x256xi1>, vector<64x256xf32>
    %13 = arith.addf %0, %12 : vector<64x256xf32>
    %cst_5 = arith.constant 0.000000e+00 : f32
    %14 = vector.broadcast %cst_5 : f32 to vector<64x256xf32>
    %15 = arith.maximumf %13, %14 : vector<64x256xf32>
    %16 = arith.mulf %13, %2 : vector<64x256xf32>
    %17 = arith.subf %15, %16 : vector<64x256xf32>
    %18 = math.absf %13 : vector<64x256xf32>
    %cst_6 = arith.constant 0.000000e+00 : f32
    %19 = vector.broadcast %cst_6 : f32 to vector<64x256xf32>
    %20 = arith.subf %19, %18 : vector<64x256xf32>
    %21 = math.exp %20 : vector<64x256xf32>
    %22 = math.log1p %21 : vector<64x256xf32>
    %23 = arith.addf %17, %22 : vector<64x256xf32>
    %c256_i32 = arith.constant 256 : i32
    %24 = vector.broadcast %c256_i32 : i32 to vector<64x256xi32>
    %25 = arith.cmpi slt, %7, %24 : vector<64x256xi32>
    %cst_7 = arith.constant 0.000000e+00 : f32
    %26 = vector.broadcast %cst_7 : f32 to vector<64x256xf32>
    %27 = arith.select %25, %23, %26 : vector<64x256xi1>, vector<64x256xf32>
    %cst_8 = arith.constant dense<0.000000e+00> : vector<256xf32>
    %28 = vector.multi_reduction <add>, %27, %cst_8 [0] : vector<64x256xf32> to vector<256xf32>
    %29 = vector.shape_cast %28 : vector<256xf32> to vector<1x256xf32>
    %30 = vector.shape_cast %29 : vector<1x256xf32> to vector<1x1x256xf32>
    %c0_9 = arith.constant 0 : index
    %c0_10 = arith.constant 0 : index
    %c0_11 = arith.constant 0 : index
    %31 = vector.load %arg5[%c0_9, %c0_10, %c0_11] : memref<1x1x256xf32, #tpu.memory_space<vmem>>, vector<1x1x256xf32>
    tpu.vector_store %arg5[%c0_9, %c0_10, %c0_11], %30 {strides = array<i32>} : memref<1x1x256xf32, #tpu.memory_space<vmem>>, vector<1x1x256xf32>,
    return
  }
  func.func @transform_0(%arg0: i32, %arg1: memref<1xi32, #tpu.memory_space<smem>>) -> (i32, i32) {
    %c0_i32 = arith.constant 0 : i32
    %c0_i32_0 = arith.constant 0 : i32
    return %arg0, %c0_i32 : i32, i32
  }
  func.func @transform_1(%arg0: i32, %arg1: memref<1xi32, #tpu.memory_space<smem>>) -> (i32, i32) {
    %c0_i32 = arith.constant 0 : i32
    %c0_i32_0 = arith.constant 0 : i32
    return %arg0, %c0_i32 : i32, i32
  }
  func.func @transform_2(%arg0: i32, %arg1: memref<1xi32, #tpu.memory_space<smem>>) -> (i32, i32) {
    %c0_i32 = arith.constant 0 : i32
    %c0_i32_0 = arith.constant 0 : i32
    %c0_i32_1 = arith.constant 0 : i32
    return %c0_i32, %c0_i32_0 : i32, i32
  }
  func.func @transform_3(%arg0: i32, %arg1: memref<1xi32, #tpu.memory_space<smem>>) -> (i32, i32, i32) {
    %c0_i32 = arith.constant 0 : i32
    %c0_i32_0 = arith.constant 0 : i32
    %c0_i32_1 = arith.constant 0 : i32
    return %arg0, %c0_i32, %c0_i32_0 : i32, i32, i32
  }
}

</mosaic_0001>

<bundles_post_ra>
// kernel: tpu_custom_call.1
= control target key start
LH: loop header
LB: loop body
LE: loop exit
PB: predicated region body
PF: predicated region fallthrough
CT: control target
= control target key end

     0   :  { %10 = vsyncpa [#allocation5], 0  ;;  %s1855_s0 = inlined_call_operand.<no memory space> [shape: s32[1], index: 0, kind: input, shape index: {}]   ;;  %s1856_s1 = inlined_call_operand.hbm [shape: f32[256,256], index: 1, kind: input, shape index: {}]   ;;  %s1857_s2 = inlined_call_operand.hbm [shape: s8[256,256], index: 2, kind: input, shape index: {}]   ;;  %s1858_s3 = inlined_call_operand.vmem [shape: f32[1,256], index: 3, kind: input, shape index: {}]   ;;  %s1859_s4 = inlined_call_operand.hbm [shape: f32[4,1,256], index: 4, kind: output, shape index: {}]  }
   0x1   :  { %12 = vsyncpa [#allocation5 + $0x1], 0 }
   0x2   :  { %13 = vsyncpa [#allocation8], 0 }
   0x3   :  { %15 = vsyncpa [#allocation8 + $0x1], 0 }
   0x4   :  { %16 = vsyncpa [#allocation6], 0 }
   0x5   :  { %18 = vsyncpa [#allocation6 + $0x1], 0  ;;  %s1104_s15 = smov 0   ;;  %s1106_s0 = smov 0  }
   0x6   :  { %s1108_s16 = smov 0   ;;  %s1110_s17 = smov 0  }
   0x7 LB: > { %s1125_s18 = sadd.s32 4294967295, %s1071_s17   ;;  %s803_s19 = sadd.s32 4294967294, %s1071_s17   ;;  %s1071_s17 = sphi %s1110_s17, %s1931_s17   ;;  %s1067_s16 = sphi %s1108_s16, %s1930_s16   ;;  %s1063_s0 = sphi %s1106_s0, %s1929_s0   ;;  %s1059_s15 = sphi %s1104_s15, %s1928_s15  }
   0x8   : > { %s1129_s20 = sadd.s32 1, %s1071_s17   ;;  %s31_s21 = sadd.s32 1, %s1067_s16 }
   0x9   : > { %s28_s22 = ssub.s32 %s1071_s17, %s1129_s20  ;;  %p38_p0 = scmp.ne.s32.totalorder %s1067_s16, %s1063_s0 }
   0xa   : > { %p29_p1 = scmp.eq.s32.totalorder %s28_s22, 0  ;;  %p39_p2 = scmp.eq.s32.totalorder %s1071_s17, 0 }
   0xb   : > { %p44_p3 = scmp.ne.s32.totalorder %s1063_s0, %s1059_s15  ;;  %p45_p4 = scmp.eq.s32.totalorder %s1125_s18, 0 }
   0xc   : > { %s1141_s23 = scalar_select %p29_p1, %s1067_s16, %s31_s21  }
   0xd   : > { %p1143_p5 = por %p39_p2, %p38_p0  ;;  %p1147_p6 = por %p45_p4, %p44_p3 }
   0xe   : > { %p115_p7 = scmp.eq.s32.totalorder %s1125_s18, 3  ;;  %p121_p8 = scmp.eq.s32.totalorder %s803_s19, 3 }
   0xf   : > { %s1865_s25 = scalar_select %p1147_p6, 1, 0 }
  0x10   : > { %p846_p9 = scmp.lt.s32.totalorder %s1071_s17, 4  ;;  %p1153_p10 = por %p115_p7, %p38_p0 }
  0x11   : > { %p1157_p11 = por %p121_p8, %p44_p3  ;;  %s1162_s28 = sand.u32 1, %s1067_s16  }
  0x12   : > { %s1866_s26 = scalar_select %p1153_p10, 1, 0 }
  0x13   : > { %s1867_s27 = scalar_select %p1157_p11, 1, 0 }
  0x14   : > { %s825_s29 = sshll.u32 %s1071_s17, 11  ;;  %s806_s30 = sshll.u32 %s1162_s28, 7 }
  0x15   : > { %s1169_s7 = scalar_lea.hbm %s1856_s1, %s825_s29  ;;  %s148_s8 = scalar_lea.vmem [#allocation4], %s806_s30 }
  0x16   : > { %s156_s9 = sshll.u32 %s148_s8, 4  ;;  %p1173_p12 = pnand %p846_p9, %p1143_p5  ;;  %s1177_s9 = int_to_ptr.vmem [resolvable:$true] %s156_s9 }
  0x17   : > { %s145_s11 = scalar_lea.sflag [#allocation5], %s1162_s28  ;;  %s947_s12 = scalar_lea.hbm %s1169_s7, 2048 }
  0x18   : > { %p948_p13 = scmp.ne.s32.totalorder %s1169_s7, %s947_s12  ;;  %p949_p0 = pneg %p1173_p12 }
  0x19   : > { %s952_s19 = scalar_lea.hbm %s1856_s1, 8192  ;;  %p953_p3 = scmp.lt.s32.totalorder %s1169_s7, %s1856_s1 }
  0x1a   : > { %p950_p1 = pnand %p949_p0, %p948_p13  ;;  %p954_p4 = scmp.lt.s32.totalorder %s952_s19, %s947_s12 }
  0x1c   : > { %p951_p2 = pneg %p950_p1  ;;  %p955_p5 = por %p954_p4, %p953_p3 }
  0x1e   : > { %p956_p7 = pnand %p955_p5, %p951_p2 }
  0x20   : > { %959 = shalt.err (!%p956_p7)
}
  0x21   : > { %s960_s24 = scalar_lea.vmem %s1177_s9, 2048  ;;  %s1073_s29 = smov [#allocation4]  }
  0x22   : > { %p961_p8 = scmp.ne.s32.totalorder %s1177_s9, %s960_s24  ;;  %s965_s30 = sshll.u32 %s1073_s29, 4  ;;  %s966_s30 = int_to_ptr.vmem [resolvable:$false] %s965_s30 }
  0x23   : > { %s967_s5 = scalar_lea.vmem %s966_s30, 4096  ;;  %p968_p1 = scmp.lt.s32.totalorder %s1177_s9, %s966_s30 }
  0x24   : > { %p963_p9 = pnand %p961_p8, %p949_p0  ;;  %p969_p11 = scmp.lt.s32.totalorder %s967_s5, %s960_s24 }
  0x26   : > { %p964_p13 = pneg %p963_p9  ;;  %p970_p10 = por %p969_p11, %p968_p1 }
  0x28   : > { %p971_p3 = pnand %p970_p10, %p964_p13 }
  0x2a   : > { %974 = shalt.err (!%p971_p3)
}
  0x2b   : > { %s1074_s6 = smov 256   ;;  %s1075_s8 = smov 16  }
  0x2c   : > { %838 = dma.hbm_to_vmem [thread:$0]  (!%p1173_p12), %s1169_s7, 2048, %s1177_s9, %s145_s11, %s1074_s6, %s1074_s6, %s1075_s8  }
  0x2d   : > { %p814_p10 = scmp.ge.s32.totalorder %s1071_s17, 1  ;;  %p186_p11 = scmp.lt.s32.totalorder %s1071_s17, 5 }
  0x2e   : > { %s810_s12 = sshll.u32 %s1162_s28, 5  ;;  %s827_s14 = sshll.u32 %s1071_s17, 9 }
  0x2f   : > { %p1212_p2 = pnand %p814_p10, %p186_p11  ;;  %s170_s19 = scalar_lea.vmem [#allocation7], %s810_s12 }
  0x30   : > { %s178_s21 = sshll.u32 %s170_s19, 4  ;;  %s1220_s29 = scalar_lea.hbm %s1857_s2, %s827_s14  ;;  %s1222_s21 = int_to_ptr.vmem [resolvable:$true] %s178_s21 }
  0x31   : > { %s167_s7 = scalar_lea.sflag [#allocation8], %s1162_s28  ;;  %s975_s9 = scalar_lea.hbm %s1220_s29, 512 }
  0x32   : > { %p976_p4 = scmp.ne.s32.totalorder %s1220_s29, %s975_s9  ;;  %s980_s5 = scalar_lea.hbm %s1857_s2, 2048 }
  0x33   : > { %p981_p8 = scmp.lt.s32.totalorder %s1220_s29, %s1857_s2  ;;  %p982_p9 = scmp.lt.s32.totalorder %s980_s5, %s975_s9 }
  0x34   : > { %p978_p5 = pnand %p976_p4, %p949_p0 }
  0x35   : > { %p983_p13 = por %p982_p9, %p981_p8 }
  0x36   : > { %p979_p7 = pneg %p978_p5 }
  0x38   : > { %p984_p1 = pnand %p983_p13, %p979_p7 }
  0x3a   : > { %987 = shalt.err (!%p984_p1)
}
  0x3b   : > { %s988_s28 = scalar_lea.vmem %s1222_s21, 512  ;;  %s1076_s14 = smov [#allocation7]  }
  0x3c   : > { %p989_p3 = scmp.ne.s32.totalorder %s1222_s21, %s988_s28  ;;  %s993_s22 = sshll.u32 %s1076_s14, 4  ;;  %s994_s22 = int_to_ptr.vmem [resolvable:$false] %s993_s22 }
  0x3d   : > { %s995_s24 = scalar_lea.vmem %s994_s22, 1024  ;;  %p996_p4 = scmp.lt.s32.totalorder %s1222_s21, %s994_s22 }
  0x3e   : > { %p991_p10 = pnand %p989_p3, %p949_p0  ;;  %p997_p5 = scmp.lt.s32.totalorder %s995_s24, %s988_s28 }
  0x40   : > { %p992_p11 = pneg %p991_p10  ;;  %p998_p6 = por %p997_p5, %p996_p4 }
  0x42   : > { %p999_p8 = pnand %p998_p6, %p992_p11 }
  0x44   : > { %1002 = shalt.err (!%p999_p8)
}
  0x45   : > { %841 = dma.hbm_to_vmem [thread:$0]  (!%p1173_p12), %s1220_s29, 512, %s1222_s21, %s167_s7, %s1074_s6, %s1074_s6, %s1075_s8  }
  0x46   : > { %190 = sbr.rel (%p1212_p2) target bundleno = 218 (0xda), region = 32 }
  0x4b   : > { %s1253_s9 = sand.u32 1, %s1063_s0   ;;  %p1870_p6 = scmp.ne.s32.totalorder %s1865_s25, 0 }
  0x4c   : > { %s815_s11 = sshll.u32 %s1253_s9, 7  ;;  %s193_s30 = scalar_lea.sflag [#allocation5], %s1253_s9 }
  0x4d   : > { %s1257_s5 = scalar_lea.vmem [#allocation4], %s815_s11 }
  0x4e   : > { %1046 = dma.done.wait (%p1870_p6), %s193_s30, 2048  }
  0x4f   : > { %1048 = vsyncadd (%p1870_p6), %s193_s30, 4294965248  ;;  %s816_s10 = sshll.u32 %s1253_s9, 5  ;;  %s202_s6 = scalar_lea.sflag [#allocation8], %s1253_s9 }
  0x50   : > { %s205_s8 = scalar_lea.vmem [#allocation7], %s816_s10 }
  0x51   : > { %1050 = dma.done.wait (%p1870_p6), %s202_s6, 512  }
  0x52   : > { %1052 = vsyncadd (%p1870_p6), %s202_s6, 4294966784  ;;  %v1862_v0 = vlaneseq  ;;  %s818_s13 = sshll.u32 %s1125_s18, 6  ;;  %v251_v10 = vld [vmem:[%s205_s8] sm:$0xff]  ;;  %v252_v11 = vld [vmem:[%s205_s8 + $0x8] sm:$0xff]  ;;  %s817_s29 = sshll.u32 %s1253_s9, 1 }
  0x53   : > { %v298_v2 = vstv %s818_s13  ;;  %v253_v17 = vld [vmem:[%s205_s8 + $0x10] sm:$0xff]  ;;  %v254_v18 = vld [vmem:[%s205_s8 + $0x18] sm:$0xff]  ;;  %v255_v23 = vunpack.c.0.s8 %v251_v10  ;;  %v256_v24 = vunpack.c.0.s8 %v252_v11  ;;  %v257_v25 = vunpack.c.1.s8 %v251_v10  ;;  %v287_v31 = vld [vmem:[%s1858_s3] sm:$0x3]  ;;  %s828_s7 = sshll.u32 %s1125_s18, 5  ;;  %s232_s12 = scalar_lea.vmem [#allocation9], %s817_s29 }
  0x54   : > { %v1271_v1 = vshrl.u32 %v1862_v0, 7  ;;  %v258_v27 = vunpack.c.1.s8 %v252_v11  ;;  %v259_v28 = vunpack.c.2.s8 %v251_v10  ;;  %v260_v29 = vunpack.c.2.s8 %v252_v11  ;;  %v235_v56 = vld [vmem:[%s1257_s5] sm:$0xff]  ;;  %v236_v61 = vld [vmem:[%s1257_s5 + $0x8] sm:$0xff]  ;;  %v237_v62 = vld [vmem:[%s1257_s5 + $0x10] sm:$0xff]  ;;  %s710_s19 = sshll.u32 %s232_s12, 4  ;;  %s708_s22 = scalar_lea.hbm %s1859_s4, %s828_s7  ;;  %s711_s19 = int_to_ptr.vmem [resolvable:$true] %s710_s19 }
  0x55   : > { %v261_v30 = vunpack.c.3.s8 %v251_v10  ;;  %v262_v32 = vunpack.c.3.s8 %v252_v11  ;;  %v263_v33 = vunpack.c.0.s8 %v253_v17  ;;  %v264_v34 = vunpack.c.0.s8 %v254_v18  ;;  %v238_v63 = vld [vmem:[%s1257_s5 + $0x18] sm:$0xff]  ;;  %s696_s24 = scalar_lea.sflag [#allocation6], %s1253_s9  ;;  %s1003_s11 = scalar_lea.vmem %s711_s19, 32 }
  0x56   : > { %1871 = vst [vmem:[#allocation13_spill] sm:$0xff] %v1271_v1  ;;  %v290_v3 = vadd.s32 8, %v1271_v1  ;;  %v291_v4 = vadd.s32 16, %v1271_v1  ;;  %v292_v5 = vadd.s32 24, %v1271_v1  ;;  %v293_v6 = vadd.s32 32, %v1271_v1  ;;  %p1004_p12 = scmp.ne.s32.totalorder %s711_s19, %s1003_s11  ;;  %p1926_p0 = scmp.ne.s32.totalorder %s1866_s26, 0 }
  0x57   : > { %v294_v7 = vadd.s32 40, %v1271_v1  ;;  %v295_v8 = vadd.s32 48, %v1271_v1  ;;  %v296_v9 = vadd.s32 56, %v1271_v1  ;;  %v1281_v12 = vadd.s32 %v298_v2, %v1271_v1  ;;  %s1078_s30 = smov [#allocation9]  }
  0x58   : > { %v1283_v13 = vadd.s32 %v298_v2, %v290_v3  ;;  %v1285_v14 = vadd.s32 %v298_v2, %v291_v4  ;;  %v1287_v15 = vadd.s32 %v298_v2, %v292_v5  ;;  %v1289_v16 = vadd.s32 %v298_v2, %v293_v6  ;;  %v239_v6 = vld [vmem:[%s1257_s5 + $0x20] sm:$0xff]  ;;  %p1005_p2 = pnand %p1004_p12, %p1926_p0  ;;  %s1007_s18 = sshll.u32 %s1078_s30, 4  ;;  %s1008_s18 = int_to_ptr.vmem [resolvable:$false] %s1007_s18 }
  0x59   : > { %v1291_v19 = vadd.s32 %v298_v2, %v294_v7  ;;  %v1293_v20 = vadd.s32 %v298_v2, %v295_v8  ;;  %v1295_v21 = vadd.s32 %v298_v2, %v296_v9  ;;  %v310_v22 = vsub.s32 0, %v1271_v1  ;;  %v240_v7 = vld [vmem:[%s1257_s5 + $0x28] sm:$0xff]  ;;  %v241_v8 = vld [vmem:[%s1257_s5 + $0x30] sm:$0xff]  ;;  %p1010_p9 = scmp.lt.s32.totalorder %s711_s19, %s1008_s18 }
  0x5a   : > { %v314_v26 = vsub.s32 1, %v1271_v1  ;;  %v265_v35 = vunpack.c.1.s8 %v253_v17  ;;  %v266_v36 = vunpack.c.1.s8 %v254_v18  ;;  %v267_v37 = vunpack.c.2.s8 %v253_v17  ;;  %p1006_p7 = pneg %p1005_p2 }
  0x5b   : > { %1872 = vst [vmem:[#allocation14_spill] sm:$0xff] %v1295_v21  ;;  %v268_v38 = vunpack.c.2.s8 %v254_v18  ;;  %v269_v39 = vunpack.c.3.s8 %v253_v17  ;;  %v1302_v40 = vcvt.s32.f32 %v255_v23  ;;  %v1304_v41 = vcvt.s32.f32 %v256_v24  ;;  %v244_v23 = vld [vmem:[%s1257_s5 + $0x48] sm:$0xff] }
  0x5c   : > { %v311_v42 = vrot.slane %v287_v31, %v310_v22  ;;  %v315_v43 = vrot.slane %v287_v31, %v314_v26  ;;  %v270_v44 = vunpack.c.3.s8 %v254_v18  ;;  %v1306_v45 = vcvt.s32.f32 %v257_v25  ;;  %v242_v18 = vld [vmem:[%s1257_s5 + $0x38] sm:$0xff]  ;;  %v243_v22 = vld [vmem:[%s1257_s5 + $0x40] sm:$0xff] }
  0x5d   : > { %v1308_v46 = vcvt.s32.f32 %v258_v27  ;;  %v1310_v47 = vcvt.s32.f32 %v259_v28  ;;  %v1312_v48 = vcvt.s32.f32 %v260_v29  ;;  %v1314_v49 = vcvt.s32.f32 %v261_v30  ;;  %v245_v28 = vld [vmem:[%s1257_s5 + $0x50] sm:$0xff]  ;;  %v246_v29 = vld [vmem:[%s1257_s5 + $0x58] sm:$0xff]  ;;  %v247_v30 = vld [vmem:[%s1257_s5 + $0x60] sm:$0xff] }
  0x5e   : > { %v1316_v50 = vcvt.s32.f32 %v262_v32  ;;  %v1318_v51 = vcvt.s32.f32 %v263_v33  ;;  %v1320_v52 = vcvt.s32.f32 %v264_v34  ;;  %v1322_v53 = vcvt.s32.f32 %v265_v35  ;;  %v248_v35 = vld [vmem:[%s1257_s5 + $0x68] sm:$0xff] }
  0x5f   : > { %v1324_v54 = vcvt.s32.f32 %v266_v36  ;;  %v1326_v55 = vcvt.s32.f32 %v267_v37  ;;  %v1329_v57 = vcvt.s32.f32 %v268_v38  ;;  %v1331_v58 = vcvt.s32.f32 %v269_v39  ;;  %v249_v36 = vld [vmem:[%s1257_s5 + $0x70] sm:$0xff] }
  0x60   : > { %v318_v59 = vmul.f32 %v311_v42, %v1302_v40  ;;  %v319_v60 = vmul.f32 %v315_v43, %v1304_v41  ;;  %v1338_v2 = vcvt.s32.f32 %v270_v44  ;;  %v320_v3 = vmul.f32 %v311_v42, %v1306_v45 }
  0x61   : > { %v321_v4 = vmul.f32 %v315_v43, %v1308_v46  ;;  %v322_v5 = vmul.f32 %v311_v42, %v1310_v47  ;;  %v323_v9 = vmul.f32 %v315_v43, %v1312_v48  ;;  %v324_v10 = vmul.f32 %v311_v42, %v1314_v49 }
  0x62   : > { %v325_v11 = vmul.f32 %v315_v43, %v1316_v50  ;;  %v326_v17 = vmul.f32 %v311_v42, %v1318_v51  ;;  %v327_v24 = vmul.f32 %v315_v43, %v1320_v52  ;;  %v328_v25 = vmul.f32 %v311_v42, %v1322_v53 }
  0x63   : > { %v329_v26 = vmul.f32 %v315_v43, %v1324_v54  ;;  %v330_v27 = vmul.f32 %v311_v42, %v1326_v55  ;;  %v331_v31 = vmul.f32 %v315_v43, %v1329_v57  ;;  %v332_v32 = vmul.f32 %v311_v42, %v1331_v58 }
  0x64   : > { %v1362_v33 = vadd.f32 %v318_v59, %v235_v56  ;;  %v1364_v34 = vadd.f32 %v319_v60, %v236_v61  ;;  %v333_v37 = vmul.f32 %v315_v43, %v1338_v2  ;;  %v1369_v38 = vadd.f32 %v320_v3, %v237_v62 }
  0x65   : > { %v1371_v39 = vadd.f32 %v321_v4, %v238_v63  ;;  %v1373_v44 = vadd.f32 %v322_v5, %v239_v6  ;;  %v1375_v0 = vadd.f32 %v323_v9, %v240_v7  ;;  %v1377_v1 = vadd.f32 %v324_v10, %v241_v8 }
  0x66   : > { %v1379_v21 = vadd.f32 %v325_v11, %v242_v18  ;;  %v1381_v42 = vadd.f32 %v326_v17, %v243_v22  ;;  %v1383_v56 = vadd.f32 %v327_v24, %v244_v23  ;;  %v1385_v59 = vadd.f32 %v328_v25, %v245_v28  ;;  %v250_v24 = vld [vmem:[%s1257_s5 + $0x78] sm:$0xff]  ;;  %s1009_s5 = scalar_lea.vmem %s1008_s18, 64 }
  0x67   : > { %v1387_v60 = vadd.f32 %v329_v26, %v246_v29  ;;  %v1389_v43 = vadd.f32 %v330_v27, %v247_v30  ;;  %v1391_v61 = vadd.f32 %v331_v31, %v248_v35  ;;  %v1393_v62 = vadd.f32 %v332_v32, %v249_v36  ;;  %p1011_p13 = scmp.lt.s32.totalorder %s1009_s5, %s1003_s11 }
  0x68   : > { %v398_v63 = vand.u32 2147483647, %v1362_v33  ;;  %v399_v3 = vand.u32 2147483647, %v1364_v34  ;;  %v350_v4 = vmax.f32 %v1362_v33, 0.0  ;;  %v351_v5 = vmax.f32 %v1364_v34, 0.0 }
  0x69   : > { %v400_v6 = vand.u32 2147483647, %v1369_v38  ;;  %v401_v7 = vand.u32 2147483647, %v1371_v39  ;;  %v352_v8 = vmax.f32 %v1369_v38, 0.0  ;;  %v1417_v18 = vadd.f32 %v333_v37, %v250_v24  ;;  %p1012_p1 = por %p1011_p13, %p1010_p9 }
  0x6a   : > { %v402_v11 = vand.u32 2147483647, %v1373_v44  ;;  %v403_v26 = vand.u32 2147483647, %v1375_v0  ;;  %v414_v27 = vsub.f32 0.0, %v398_v63  ;;  %v415_v28 = vsub.f32 0.0, %v399_v3 }
  0x6b   : > { %v404_v30 = vand.u32 2147483647, %v1377_v1  ;;  %v416_v31 = vsub.f32 0.0, %v400_v6  ;;  %v417_v32 = vsub.f32 0.0, %v401_v7  ;;  %v405_v25 = vand.u32 2147483647, %v1379_v21  ;;  %p1013_p3 = pnand %p1012_p1, %p1006_p7 }
  0x6c   : > { %v418_v23 = vsub.f32 0.0, %v402_v11  ;;  %v406_v63 = vand.u32 2147483647, %v1381_v42  ;;  %v407_v3 = vand.u32 2147483647, %v1383_v56  ;;  %v419_v17 = vsub.f32 0.0, %v403_v26 }
  0x6d   : > { %v430_v6 = vmul.f32 1.442695, %v414_v27  ;;  %v432_v7 = vmul.f32 1.442695, %v415_v28  ;;  %v365_v35 = vmax.f32 %v1417_v18, 0.0  ;;  %v420_v10 = vsub.f32 0.0, %v404_v30 }
  0x6e   : > { %v434_v36 = vmul.f32 1.442695, %v416_v31  ;;  %v436_v9 = vmul.f32 1.442695, %v417_v32  ;;  %v366_v37 = vmul.f32 %v1362_v33, %v1302_v40  ;;  %v408_v11 = vand.u32 2147483647, %v1385_v59 }
  0x6f   : > { %883 = vpow2.f32 %v430_v6  ;;  %v438_v24 = vmul.f32 1.442695, %v418_v23  ;;  %v367_v22 = vmul.f32 %v1364_v34, %v1304_v41  ;;  %v409_v29 = vand.u32 2147483647, %v1387_v60 }
  0x70   : > { %v421_v26 = vsub.f32 0.0, %v405_v25  ;;  %885 = vpow2.f32 %v432_v7  ;;  %v410_v27 = vand.u32 2147483647, %v1389_v43  ;;  %v422_v28 = vsub.f32 0.0, %v406_v63 }
  0x71   : > { %887 = vpow2.f32 %v434_v36  ;;  %v440_v30 = vmul.f32 1.442695, %v419_v17  ;;  %v411_v31 = vand.u32 2147483647, %v1391_v61  ;;  %v423_v32 = vsub.f32 0.0, %v407_v3 }
  0x72   : > { %889 = vpow2.f32 %v436_v9  ;;  %v442_v40 = vmul.f32 1.442695, %v420_v10  ;;  %v368_v23 = vmul.f32 %v1369_v38, %v1306_v45  ;;  %v412_v6 = vand.u32 2147483647, %v1393_v62 }
  0x73   : > { %v424_v41 = vsub.f32 0.0, %v408_v11  ;;  %891 = vpow2.f32 %v438_v24  ;;  %v369_v25 = vmul.f32 %v1371_v39, %v1308_v46  ;;  %v370_v63 = vmul.f32 %v1373_v44, %v1310_v47 }
  0x74   : > { %v425_v36 = vsub.f32 0.0, %v409_v29  ;;  %v444_v17 = vmul.f32 1.442695, %v421_v26  ;;  %v371_v3 = vmul.f32 %v1375_v0, %v1312_v48  ;;  %v426_v9 = vsub.f32 0.0, %v410_v27 }
  0x75   : > { %893 = vpow2.f32 %v440_v30  ;;  %v446_v10 = vmul.f32 1.442695, %v422_v28  ;;  %v372_v45 = vmul.f32 %v1377_v1, %v1314_v49  ;;  %v427_v7 = vsub.f32 0.0, %v411_v31 }
  0x76   : > { %895 = vpow2.f32 %v442_v40  ;;  %v448_v11 = vmul.f32 1.442695, %v423_v32  ;;  %v373_v46 = vmul.f32 %v1379_v21, %v1316_v50  ;;  %v374_v47 = vmul.f32 %v1381_v42, %v1318_v51 }
  0x77   : > { %v428_v29 = vsub.f32 0.0, %v412_v6  ;;  %v450_v24 = vmul.f32 1.442695, %v424_v41  ;;  %v375_v48 = vmul.f32 %v1383_v56, %v1320_v52  ;;  %v413_v26 = vand.u32 2147483647, %v1417_v18 }
  0x78   : > { %897 = vpow2.f32 %v444_v17  ;;  %v452_v27 = vmul.f32 1.442695, %v425_v36  ;;  %v376_v49 = vmul.f32 %v1385_v59, %v1322_v53  ;;  %v377_v28 = vmul.f32 %v1387_v60, %v1324_v54 }
  0x79   : > { %899 = vpow2.f32 %v446_v10  ;;  %v454_v50 = vmul.f32 1.442695, %v426_v9  ;;  %v378_v51 = vmul.f32 %v1389_v43, %v1326_v55  ;;  %v379_v30 = vmul.f32 %v1391_v61, %v1329_v57 }
  0x7a   : > { %901 = vpow2.f32 %v448_v11  ;;  %v456_v52 = vmul.f32 1.442695, %v427_v7  ;;  %v380_v31 = vmul.f32 %v1393_v62, %v1331_v58  ;;  %v381_v32 = vmul.f32 %v1417_v18, %v1338_v2 }
  0x7b   : > { %903 = vpow2.f32 %v450_v24  ;;  %v458_v53 = vmul.f32 1.442695, %v428_v29  ;;  %v1466_v54 = vsub.f32 %v350_v4, %v366_v37  ;;  %v1470_v55 = vsub.f32 %v351_v5, %v367_v22 }
  0x7c   : > { %v1462_v40 = vpop.eup %883  ;;  %v429_v57 = vsub.f32 0.0, %v413_v26  ;;  %905 = vpow2.f32 %v452_v27  ;;  %v1476_v58 = vsub.f32 %v352_v8, %v368_v23  ;;  %v1873_v2 = vmax.f32 %v1371_v39, 0.0 }
  0x7d   : > { %v1472_v6 = vpop.eup %885  ;;  %907 = vpow2.f32 %v454_v50  ;;  %v462_v33 = vadd.f32 1.0, %v1462_v40  ;;  %v1874_v34 = vmax.f32 %v1373_v44, 0.0  ;;  %v1875_v22 = vmax.f32 %v1375_v0, 0.0 }
  0x7e   : > { %v1480_v41 = vsub.f32 %v1873_v2, %v369_v25  ;;  %v1483_v4 = vpop.eup %887  ;;  %909 = vpow2.f32 %v456_v52  ;;  %v471_v38 = vadd.f32 1.0, %v1472_v6  ;;  %v1876_v39 = vmax.f32 %v1377_v1, 0.0 }
  0x7f   : > { %v1487_v5 = vsub.f32 %v1874_v34, %v370_v63  ;;  %v1491_v37 = vsub.f32 %v1875_v22, %v371_v3  ;;  %v1494_v8 = vpop.eup %889  ;;  %v1877_v25 = vmax.f32 %v1379_v21, 0.0  ;;  %911 = vpow2.f32 %v458_v53 }
  0x80   : > { %v1498_v23 = vsub.f32 %v1876_v39, %v372_v45  ;;  %v480_v44 = vadd.f32 1.0, %v1483_v4  ;;  %v1505_v63 = vpop.eup %891  ;;  %v1878_v0 = vmax.f32 %v1381_v42, 0.0  ;;  %v460_v3 = vmul.f32 1.442695, %v429_v57 }
  0x81   : > { %v1502_v36 = vsub.f32 %v1877_v25, %v373_v46  ;;  %913 = vlog2.f32 %v462_v33  ;;  %v465_v9 = vmul.f32 -0.5, %v1462_v40  ;;  %v1879_v1 = vmax.f32 %v1383_v56, 0.0 }
  0x82   : > { %v1509_v17 = vsub.f32 %v1878_v0, %v374_v47  ;;  %v1880_v21 = vmax.f32 %v1385_v59, 0.0  ;;  %915 = vlog2.f32 %v471_v38  ;;  %v489_v7 = vadd.f32 1.0, %v1494_v8  ;;  %v1521_v11 = vpop.eup %893 }
  0x83   : > { %v1514_v10 = vsub.f32 %v1879_v1, %v375_v48  ;;  %v1881_v42 = vmax.f32 %v1387_v60, 0.0  ;;  %v1882_v47 = vmax.f32 %v1389_v43, 0.0  ;;  %v474_v56 = vmul.f32 -0.5, %v1472_v6  ;;  %v1532_v24 = vpop.eup %895 }
  0x84   : > { %v1518_v45 = vsub.f32 %v1880_v21, %v376_v49  ;;  %917 = vlog2.f32 %v480_v44  ;;  %v1883_v59 = vmax.f32 %v1391_v61, 0.0  ;;  %v483_v26 = vmul.f32 -0.5, %v1483_v4 }
  0x85   : > { %v1525_v46 = vsub.f32 %v1881_v42, %v377_v28  ;;  %v1529_v29 = vsub.f32 %v1882_v47, %v378_v51  ;;  %919 = vlog2.f32 %v489_v7  ;;  %v498_v60 = vadd.f32 1.0, %v1505_v63  ;;  %v1548_v50 = vpop.eup %897 }
  0x86   : > { %v1536_v48 = vsub.f32 %v1883_v59, %v379_v30  ;;  %v1885_v27 = vmax.f32 %v1393_v62, 0.0  ;;  %v1546_v43 = vsub.f32 %v365_v35, %v381_v32  ;;  %921 = vpow2.f32 %v460_v3  ;;  %v1553_v52 = vpop.eup %899 }
  0x87   : > { %v466_v28 = vadd.f32 1.0, %v465_v9  ;;  %v468_v61 = vand.u32 2147483647, %v1462_v40  ;;  %v492_v51 = vmul.f32 -0.5, %v1494_v8  ;;  %923 = vlog2.f32 %v498_v60  ;;  %v1558_v32 = vpop.eup %901 }
  0x88   : > { %1884 = vst [vmem:[#allocation15_spill] sm:$0xff] %v1536_v48  ;;  %v1542_v49 = vsub.f32 %v1885_v27, %v380_v31  ;;  %1887 = vst [vmem:[#allocation17_spill] sm:$0xff] %v1546_v43  ;;  %v507_v30 = vadd.f32 1.0, %v1521_v11  ;;  %v475_v62 = vadd.f32 1.0, %v474_v56  ;;  %v477_v31 = vand.u32 2147483647, %v1472_v6  ;;  %v1562_v33 = vpop.eup %903 }
  0x89   : > { %v501_v18 = vmul.f32 -0.5, %v1505_v63  ;;  %v516_v35 = vadd.f32 1.0, %v1532_v24  ;;  %v484_v53 = vadd.f32 1.0, %v483_v26  ;;  %v486_v57 = vand.u32 2147483647, %v1483_v4  ;;  %v1569_v39 = vpop.eup %905 }
  0x8a   : > { %1886 = vst [vmem:[#allocation16_spill] sm:$0xff] %v1542_v49  ;;  %925 = vlog2.f32 %v507_v30  ;;  %v510_v2 = vmul.f32 -0.5, %v1521_v11  ;;  %v1565_v34 = vmul.f32 %v1462_v40, %v466_v28  ;;  %v519_v22 = vmul.f32 -0.5, %v1532_v24  ;;  %v1578_v40 = vpop.eup %907 }
  0x8b   : > { %927 = vlog2.f32 %v516_v35  ;;  %v525_v38 = vadd.f32 1.0, %v1548_v50  ;;  %vm1571_vm0 = vcmp.lt.f32.partialorder %v468_v61, 0.0004427343  ;;  %v493_v44 = vadd.f32 1.0, %v492_v51  ;;  %v1588_v47 = vpop.eup %909 }
  0x8c   : > { %v495_v0 = vand.u32 2147483647, %v1494_v8  ;;  %v504_v3 = vand.u32 2147483647, %v1505_v63  ;;  %v528_v9 = vmul.f32 -0.5, %v1548_v50  ;;  %v1581_v1 = vmul.f32 %v1472_v6, %v475_v62  ;;  %v1598_v60 = vpop.eup %911 }
  0x8d   : > { %vm1583_vm1 = vcmp.lt.f32.partialorder %v477_v31, 0.0004427343  ;;  %v502_v7 = vadd.f32 1.0, %v501_v18  ;;  %929 = vlog2.f32 %v525_v38  ;;  %v534_v42 = vadd.f32 1.0, %v1553_v52 }
  0x8e   : > { %v1591_v56 = vmul.f32 %v1483_v4, %v484_v53  ;;  %vm1593_vm2 = vcmp.lt.f32.partialorder %v486_v57, 0.0004427343  ;;  %v511_v26 = vadd.f32 1.0, %v510_v2  ;;  %v537_v6 = vmul.f32 -0.5, %v1553_v52  ;;  %v914_v51 = vpop.eup %913 }
  0x8f   : > { %v513_v27 = vand.u32 2147483647, %v1521_v11  ;;  %v520_v28 = vadd.f32 1.0, %v519_v22  ;;  %931 = vlog2.f32 %v534_v42  ;;  %v543_v61 = vadd.f32 1.0, %v1558_v32  ;;  %v916_v18 = vpop.eup %915 }
  0x90   : > { %v1603_v30 = vmul.f32 %v1494_v8, %v493_v44  ;;  %vm1605_vm3 = vcmp.lt.f32.partialorder %v495_v0, 0.0004427343  ;;  %vm1609_vm4 = vcmp.lt.f32.partialorder %v504_v3, 0.0004427343  ;;  %v529_v31 = vadd.f32 1.0, %v528_v9 }
  0x91   : > { %v1614_v35 = vmul.f32 %v1505_v63, %v502_v7  ;;  %v522_v53 = vand.u32 2147483647, %v1532_v24  ;;  %933 = vlog2.f32 %v543_v61  ;;  %v546_v57 = vmul.f32 -0.5, %v1558_v32  ;;  %v918_v8 = vpop.eup %917 }
  0x92   : > { %v1619_v2 = vmul.f32 %v1521_v11, %v511_v26  ;;  %v531_v22 = vand.u32 2147483647, %v1548_v50  ;;  %v538_v38 = vadd.f32 1.0, %v537_v6  ;;  %v552_v44 = vadd.f32 1.0, %v1562_v33  ;;  %v920_v0 = vpop.eup %919 }
  0x93   : > { %v1623_v3 = vmul.f32 0.6931472, %v914_v51  ;;  %vm1625_vm5 = vcmp.lt.f32.partialorder %v513_v27, 0.0004427343  ;;  %v1630_v9 = vmul.f32 %v1532_v24, %v520_v28  ;;  %v540_v7 = vand.u32 2147483647, %v1553_v52  ;;  %v1634_v42 = vpop.eup %921 }
  0x94   : > { %v555_v11 = vmul.f32 -0.5, %v1562_v33  ;;  %v1636_v26 = vmul.f32 0.6931472, %v916_v18  ;;  %v1639_v6 = vmul.f32 %v1548_v50, %v529_v31  ;;  %935 = vlog2.f32 %v552_v44  ;;  %v924_v61 = vpop.eup %923 }
  0x95   : > { %v561_v27 = vadd.f32 1.0, %v1569_v39  ;;  %v1642_v51 = vmul.f32 0.6931472, %v918_v8  ;;  %vm1644_vm6 = vcmp.lt.f32.partialorder %v522_v53, 0.0004427343  ;;  %v547_v28 = vadd.f32 1.0, %v546_v57 }
  0x96   : > { %v549_v43 = vand.u32 2147483647, %v1558_v32  ;;  %v564_v49 = vmul.f32 -0.5, %v1569_v39  ;;  %v1650_v18 = vmul.f32 0.6931472, %v920_v0  ;;  %v1657_v31 = vmul.f32 %v1553_v52, %v538_v38 }
  0x97   : > { %vm1652_vm7 = vcmp.lt.f32.partialorder %v531_v22, 0.0004427343  ;;  %937 = vlog2.f32 %v561_v27  ;;  %v570_v53 = vadd.f32 1.0, %v1578_v40  ;;  %v926_v8 = vpop.eup %925  ;;  %v470_v57 = vsel %vm1571_vm0, %v1565_v34, %v1623_v3 }
  0x98   : > { %v1664_v44 = vmul.f32 0.6931472, %v924_v61  ;;  %vm1666_vm8 = vcmp.lt.f32.partialorder %v540_v7, 0.0004427343  ;;  %v556_v22 = vadd.f32 1.0, %v555_v11  ;;  %v928_v52 = vpop.eup %927  ;;  %v479_v38 = vsel %vm1583_vm1, %v1581_v1, %v1636_v26 }
  0x99   : > { %v558_v48 = vand.u32 2147483647, %v1562_v33  ;;  %v567_v27 = vand.u32 2147483647, %v1569_v39  ;;  %939 = vlog2.f32 %v570_v53  ;;  %v573_v34 = vmul.f32 -0.5, %v1578_v40 }
  0x9a   : > { %v488_v25 = vsel %vm1593_vm2, %v1591_v56, %v1642_v51  ;;  %v1682_v3 = vmul.f32 %v1558_v32, %v547_v28  ;;  %vm1684_vm9 = vcmp.lt.f32.partialorder %v549_v43, 0.0004427343  ;;  %v565_v11 = vadd.f32 1.0, %v564_v49  ;;  %v930_v21 = vpop.eup %929 }
  0x9b   : > { %v579_v1 = vadd.f32 1.0, %v1588_v47  ;;  %v497_v26 = vsel %vm1605_vm3, %v1603_v30, %v1650_v18  ;;  %v509_v61 = vmul.f32 0.6931472, %v926_v8  ;;  %v576_v59 = vand.u32 2147483647, %v1578_v40 }
  0x9c   : > { %v582_v56 = vmul.f32 -0.5, %v1588_v47  ;;  %vm622_vm10 = vcmp.lt.s32.totalorder %v1281_v12, 256  ;;  %vm623_vm11 = vcmp.lt.s32.totalorder %v1283_v13, 256  ;;  %v506_v49 = vsel %vm1609_vm4, %v1614_v35, %v1664_v44  ;;  %v932_v4 = vpop.eup %931 }
  0x9d   : > { %v518_v43 = vmul.f32 0.6931472, %v928_v52  ;;  %v1702_v32 = vmul.f32 %v1562_v33, %v556_v22  ;;  %vm1704_vm12 = vcmp.lt.f32.partialorder %v558_v48, 0.0004427343  ;;  %941 = vlog2.f32 %v579_v1 }
  0x9e   : > { %vm1708_vm13 = vcmp.lt.f32.partialorder %v567_v27, 0.0004427343  ;;  %v574_v28 = vadd.f32 1.0, %v573_v34  ;;  %v585_v18 = vand.u32 2147483647, %v1588_v47  ;;  %v588_v62 = vadd.f32 1.0, %v1598_v60  ;;  %v934_v44 = vpop.eup %933 }
  0x9f   : > { %v591_v35 = vmul.f32 -0.5, %v1598_v60  ;;  %vm624_vm14 = vcmp.lt.s32.totalorder %v1285_v14, 256  ;;  %v527_v33 = vmul.f32 0.6931472, %v930_v21  ;;  %v566_v48 = vmul.f32 %v1569_v39, %v565_v11 }
  0xa0   : > { %v583_v53 = vadd.f32 1.0, %v582_v56  ;;  %v597_v8 = vadd.f32 1.0, %v1634_v42  ;;  %v515_v22 = vsel %vm1625_vm5, %v1619_v2, %v509_v61  ;;  %v536_v52 = vmul.f32 0.6931472, %v932_v4 }
  0xa1   : > { %vm1721_vm15 = vcmp.lt.f32.partialorder %v576_v59, 0.0004427343  ;;  %943 = vlog2.f32 %v588_v62  ;;  %vm625_vm0 = vcmp.lt.s32.totalorder %v1287_v15, 256  ;;  %v592_v34 = vadd.f32 1.0, %v591_v35  ;;  %v936_v61 = vpop.eup %935 }
  0xa2   : > { %v594_v1 = vand.u32 2147483647, %v1598_v60  ;;  %945 = vlog2.f32 %v597_v8  ;;  %v600_v39 = vmul.f32 -0.5, %v1634_v42  ;;  %v524_v11 = vsel %vm1644_vm6, %v1630_v9, %v518_v43 }
  0xa3   : > { %v545_v63 = vmul.f32 0.6931472, %v934_v44  ;;  %v575_v2 = vmul.f32 %v1578_v40, %v574_v28  ;;  %vm1732_vm1 = vcmp.lt.f32.partialorder %v585_v18, 0.0004427343  ;;  %vm626_vm2 = vcmp.lt.s32.totalorder %v1289_v16, 256  ;;  %v1922_v16 = vld [vmem:[#allocation16_spill] sm:$0xff] }
  0xa4   : > { %v533_v59 = vsel %vm1652_vm7, %v1639_v6, %v527_v33  ;;  %v584_v56 = vmul.f32 %v1588_v47, %v583_v53  ;;  %v606_v4 = vadd.f32 %v470_v57, %v1466_v54  ;;  %v608_v9 = vadd.f32 %v488_v25, %v1476_v58  ;;  %v938_v18 = vpop.eup %937 }
  0xa5   : > { %v542_v40 = vsel %vm1666_vm8, %v1657_v31, %v536_v52  ;;  %v554_v24 = vmul.f32 0.6931472, %v936_v61  ;;  %v607_v43 = vadd.f32 %v479_v38, %v1470_v55  ;;  %v609_v28 = vadd.f32 %v497_v26, %v1480_v41 }
  0xa6   : > { %vm627_vm3 = vcmp.lt.s32.totalorder %v1291_v19, 256  ;;  %v593_v6 = vmul.f32 %v1598_v60, %v592_v34  ;;  %vm1750_vm4 = vcmp.lt.f32.partialorder %v594_v1, 0.0004427343  ;;  %v601_v54 = vadd.f32 1.0, %v600_v39  ;;  %v940_v57 = vpop.eup %939  ;;  %v1920_v34 = vld [vmem:[#allocation15_spill] sm:$0xff] }
  0xa7   : > { %v610_v58 = vadd.f32 %v506_v49, %v1487_v5  ;;  %v551_v50 = vsel %vm1684_vm9, %v1682_v3, %v545_v63  ;;  %v563_v31 = vmul.f32 0.6931472, %v938_v18  ;;  %v603_v55 = vand.u32 2147483647, %v1634_v42 }
  0xa8   : > { %v611_v41 = vadd.f32 %v515_v22, %v1491_v37  ;;  %vm628_vm5 = vcmp.lt.s32.totalorder %v1293_v20, 256  ;;  %v612_v60 = vadd.f32 %v524_v11, %v1498_v23  ;;  %v613_v0 = vadd.f32 %v533_v59, %v1502_v36 }
  0xa9   : > { %v630_v38 = vsel %vm622_vm10, %v606_v4, 0.0  ;;  %v632_v5 = vsel %vm623_vm11, %v608_v9, 0.0  ;;  %v560_v25 = vsel %vm1704_vm12, %v1702_v32, %v554_v24  ;;  %v572_v3 = vmul.f32 0.6931472, %v940_v57 }
  0xaa   : > { %v631_v37 = vsel %vm622_vm10, %v607_v43, 0.0  ;;  %v633_v7 = vsel %vm623_vm11, %v609_v28, 0.0  ;;  %v569_v23 = vsel %vm1708_vm13, %v566_v48, %v563_v31  ;;  %v602_v36 = vmul.f32 %v1634_v42, %v601_v54  ;;  %v942_v62 = vpop.eup %941 }
  0xab   : > { %v614_v26 = vadd.f32 %v542_v40, %v1509_v17  ;;  %v634_v49 = vsel %vm624_vm14, %v610_v58, 0.0  ;;  %v578_v32 = vsel %vm1721_vm15, %v575_v2, %v572_v3  ;;  %v615_v12 = vadd.f32 %v551_v50, %v1514_v10  ;;  %v1921_v2 = vld [vmem:[#allocation14_spill] sm:$0xff]  ;;  %v1923_v40 = vld [vmem:[#allocation17_spill] sm:$0xff] }
  0xac   : > { %v635_v13 = vsel %vm624_vm14, %v611_v41, 0.0  ;;  %v646_v30 = vadd.f32 %v632_v5, %v630_v38  ;;  %v581_v35 = vmul.f32 0.6931472, %v942_v62  ;;  %v616_v51 = vadd.f32 %v560_v25, %v1518_v45 }
  0xad   : > { %v636_v42 = vsel %vm625_vm0, %v612_v60, 0.0  ;;  %v659_v17 = vadd.f32 %v633_v7, %v631_v37  ;;  %vm1788_vm6 = vcmp.lt.f32.partialorder %v603_v55, 0.0004427343  ;;  %v617_v48 = vadd.f32 %v569_v23, %v1525_v46 }
  0xae   : > { %v637_v10 = vsel %vm625_vm0, %v613_v0, 0.0  ;;  %v647_v53 = vadd.f32 %v646_v30, %v634_v49  ;;  %v944_v14 = vpop.eup %943  ;;  %v587_v8 = vsel %vm1732_vm1, %v584_v56, %v581_v35  ;;  %v618_v45 = vadd.f32 %v578_v32, %v1529_v29 }
  0xaf   : > { %v638_v44 = vsel %vm626_vm2, %v614_v26, 0.0  ;;  %v660_v22 = vadd.f32 %v659_v17, %v635_v13  ;;  %v946_v52 = vpop.eup %945  ;;  %v590_v27 = vmul.f32 0.6931472, %v944_v14  ;;  %v619_v1 = vadd.f32 %v587_v8, %v1920_v34  ;;  %v1924_v26 = vld [vmem:[#allocation13_spill] sm:$0xff] }
  0xb0   : > { %v639_v46 = vsel %vm626_vm2, %v615_v12, 0.0  ;;  %v648_v15 = vadd.f32 %v647_v53, %v636_v42  ;;  %v599_v39 = vmul.f32 0.6931472, %v946_v52  ;;  %v640_v11 = vsel %vm627_vm3, %v616_v51, 0.0 }
  0xb1   : > { %v661_v63 = vadd.f32 %v660_v22, %v637_v10  ;;  %v596_v29 = vsel %vm1750_vm4, %v593_v6, %v590_v27  ;;  %vm629_vm7 = vcmp.lt.s32.totalorder %v1921_v2, 256  ;;  %v641_v21 = vsel %vm627_vm3, %v617_v48, 0.0 }
  0xb2   : > { %v649_v61 = vadd.f32 %v648_v15, %v638_v44  ;;  %v605_v59 = vsel %vm1788_vm6, %v602_v36, %v599_v39  ;;  %v620_v56 = vadd.f32 %v596_v29, %v1922_v16  ;;  %v642_v4 = vsel %vm628_vm5, %v618_v45, 0.0 }
  0xb3   : > { %v662_v9 = vadd.f32 %v661_v63, %v639_v46  ;;  %v621_v24 = vadd.f32 %v605_v59, %v1923_v40  ;;  %v643_v43 = vsel %vm628_vm5, %v619_v1, 0.0  ;;  %v1077_v60 = vmov 1966171168  }
  0xb4   : > { %v650_v28 = vadd.f32 %v649_v61, %v640_v11  ;;  %v644_v18 = vsel %vm629_vm7, %v620_v56, 0.0  ;;  %v676_v0 = vunpack.c.l.s4 %v1077_v60  ;;  %v1925_v12 = vlaneseq }
  0xb5   : > { %v663_v6 = vadd.f32 %v662_v9, %v641_v21  ;;  %v645_v19 = vsel %vm629_vm7, %v621_v24, 0.0 }
  0xb6   : > { %v651_v47 = vadd.f32 %v650_v28, %v642_v4  ;;  %v677_v3 = vunpack.c.0.s8 %v676_v0  ;;  %vm692_vm8 = vcmp.lt.s32.totalorder %v1925_v12, 256 }
  0xb7   : > { %v664_v54 = vadd.f32 %v663_v6, %v643_v43 }
  0xb8   : > { %v652_v58 = vadd.f32 %v651_v47, %v644_v18  ;;  %v680_v49 = vsub.s32 %v677_v3, %v1924_v26 }
  0xb9   : > { %v665_v50 = vadd.f32 %v664_v54, %v645_v19 }
  0xba   : > { %v653_v31 = vrot.slane %v652_v58, 4 }
  0xbb   : > { %v666_v55 = vrot.slane %v665_v50, 4 }
  0xbc   : > { %v654_v41 = vadd.f32 %v653_v31, %v652_v58 }
  0xbd   : > { %v667_v57 = vadd.f32 %v666_v55, %v665_v50 }
  0xbe   : > { %v655_v38 = vrot.slane %v654_v41, 2 }
  0xbf   : > { %v668_v5 = vrot.slane %v667_v57, 2 }
  0xc0   : > { %v656_v20 = vadd.f32 %v655_v38, %v654_v41 }
  0xc1   : > { %v669_v25 = vadd.f32 %v668_v5, %v667_v57 }
  0xc2   : > { %v657_v37 = vrot.slane %v656_v20, 1 }
  0xc3   : > { %v670_v7 = vrot.slane %v669_v25, 1 }
  0xc4   : > { %v658_v23 = vadd.f32 %v657_v37, %v656_v20 }
  0xc5   : > { %v671_v36 = vadd.f32 %v670_v7, %v669_v25 }
  0xc7   : > { %v674_v62 = vcombine.low %v658_v23, %v671_v36 }
  0xc9   : > { %v681_v32 = vrot.slane %v674_v62, %v680_v49 }
  0xcb   : > { %v688_v13 = vrot.slane %v681_v32, %v680_v49 }
  0xcd   : > { %694 = vst.msk [vmem:[%s232_s12] sm:$0x3] %vm692_vm8, %v688_v13 }
  0xce   : > { %1016 = shalt.err (!%p1013_p3)
}
  0xcf   : > { %s1017_s10 = scalar_lea.hbm %s708_s22, 32  ;;  %s1021_s8 = scalar_lea.hbm %s1859_s4, 128 }
  0xd0   : > { %p1018_p10 = scmp.ne.s32.totalorder %s708_s22, %s1017_s10  ;;  %p1022_p5 = scmp.lt.s32.totalorder %s708_s22, %s1859_s4 }
  0xd1   : > { %p1023_p8 = scmp.lt.s32.totalorder %s1021_s8, %s1017_s10 }
  0xd2   : > { %p1019_p11 = pnand %p1018_p10, %p1926_p0 }
  0xd3   : > { %p1024_p6 = por %p1023_p8, %p1022_p5 }
  0xd4   : > { %p1020_p4 = pneg %p1019_p11 }
  0xd6   : > { %p1025_p12 = pnand %p1024_p6, %p1020_p4 }
  0xd8   : > { %1028 = shalt.err (!%p1025_p12)
}
  0xd9   : > { %833 = dma.vmem_to_hbm [thread:$0]  (%p1926_p0), %s711_s19, 32, %s708_s22, %s696_s24  }
  0xda PF: > { %p847_p2 = scmp.ge.s32.totalorder %s1071_s17, 2  ;;  %s722_s21 = sand.u32 1, %s1059_s15  }
  0xdb   : > { %p1927_p7 = scmp.ne.s32.totalorder %s1867_s27, 0  ;;  %s723_s29 = scalar_lea.sflag [#allocation6], %s722_s21 }
  0xdd   : > { %p843_p9 = pnand %p847_p2, %p1927_p7 }
  0xdf   : > { %p844_p13 = pneg %p843_p9 }
  0xe1   : > { %1054 = dma.done.wait (%p844_p13), %s723_s29, 32  }
  0xe2   : > { %1056 = vsyncadd (%p844_p13), %s723_s29, 4294967264  ;;  %p21_p1 = scmp.ge.s32.totalorder %s1129_s20, 6   ;;  %s1928_s15 = smov %s1063_s0 }
  0xe3   : > { %s1929_s0 = smov %s1067_s16  ;;  %s1930_s16 = smov %s1141_s23 }
  0xe4   : > { %s1931_s17 = smov %s1129_s20  ;;  %23 = sbr.rel (!%p21_p1) target bundleno = 7 (0x7), region = 90 }
  0xe9   :  { %728 = vsyncpa [#allocation5], 1 }
  0xea   :  { %730 = vsyncpa [#allocation5 + $0x1], 1 }
  0xeb   :  { %731 = vsyncpa [#allocation8], 1 }
  0xec   :  { %733 = vsyncpa [#allocation8 + $0x1], 1 }
  0xed   :  { %734 = vsyncpa [#allocation6], 1 }
  0xee   :  { %736 = vsyncpa [#allocation6 + $0x1], 1 }

</bundles_post_ra>
